<compile_context>
chip_gen: v7x
topology: tpu7x:2x2x1
jax: 0.10.0
libtpu: 0.0.40
codegen_flags: <defaults>
</compile_context>

<pallas_src>
import functools
import math

import jax
import jax.numpy as jnp
from jax.experimental import pallas as pl
from jax.experimental.pallas import tpu as pltpu


# ---------------------------------------------------------------------------
# Static tiling helpers (host side)
# ---------------------------------------------------------------------------
_LANE = 128
_VMEM_BUDGET = 24 * 1024 * 1024   # conservative working-set target (all gens)
_VMEM_LIMIT = 48 * 1024 * 1024    # scoped-VMEM limit handed to Mosaic (< 64 MiB/TC on v7x)


def _round_up(x, m):
    return ((x + m - 1) // m) * m


def _tile_and_pad(dim, pref):
    """Pick (tile, padded_dim): tile is a multiple of 128 <= pref, padded_dim a
    multiple of tile, with padding waste <= 25% (avoids degenerate 128 tiles)."""
    dim128 = _round_up(max(dim, 1), _LANE)
    t = max(_LANE, (min(pref, dim128) // _LANE) * _LANE)
    while t > _LANE:
        padded = _round_up(dim128, t)
        if (padded - dim128) * 4 <= padded:     # <= 25% waste
            return t, padded
        t -= _LANE
    return _LANE, dim128


def _largest_divisor_tile(dim, cap):
    """Largest multiple of 128 <= cap that divides dim (dim % 128 == 0)."""
    t = max(_LANE, (min(cap, dim) // _LANE) * _LANE)
    while dim % t:
        t -= _LANE
    return t


def _split_rows_for_megacore(tm, n_p):
    """Keep >= 2 tiles along the row axis when possible (v7x has 2 TCs)."""
    if n_p // tm >= 2 or tm == _LANE:
        return tm
    t = tm - _LANE
    while t >= _LANE:
        if n_p % t == 0:
            return t
        t -= _LANE
    return tm


def _pad2(a, rows, cols):
    pr, pc = rows - a.shape[0], cols - a.shape[1]
    if pr == 0 and pc == 0:
        return a                     # fast path: no host-side copy at all
    return jnp.pad(a, ((0, pr), (0, pc)))


# ---------------------------------------------------------------------------
# Pallas kernels
# ---------------------------------------------------------------------------
def _support_kernel(x_ref, w_ref, s_ref, acc_ref, *, compute_dtype):
    """support[i, j] = sum_k x[i, k] @ W[k, j]   (f32 accumulation)."""
    k = pl.program_id(2)

    @pl.when(k == 0)
    def _():
        acc_ref[...] = jnp.zeros_like(acc_ref)

    acc_ref[...] += jnp.dot(
        x_ref[...].astype(compute_dtype),
        w_ref[...].astype(compute_dtype),
        preferred_element_type=jnp.float32)

    @pl.when(k == pl.num_programs(2) - 1)
    def _():
        s_ref[...] = acc_ref[...].astype(s_ref.dtype)


def _aggregate_kernel(adj_ref, s_ref, b_ref, o_ref, acc_ref, *,
                      compute_dtype, resident_support, tk):
    """out[i, j] = sum_k adj[i, k] @ support[k, j]  (+ bias in epilogue)."""
    k = pl.program_id(2)

    @pl.when(k == 0)
    def _():
        acc_ref[...] = jnp.zeros_like(acc_ref)

    # Cast in-kernel (no HBM pre-pass over adj).
    a = adj_ref[...].astype(compute_dtype)
    if resident_support:
        off = pl.multiple_of(k * tk, _LANE)
        s = s_ref[pl.ds(off, tk), :]
    else:
        s = s_ref[...]
    acc_ref[...] += jnp.dot(a, s.astype(compute_dtype),
                            preferred_element_type=jnp.float32)

    @pl.when(k == pl.num_programs(2) - 1)
    def _():
        # bias is (1, tn) f32, broadcast-added once per output tile.
        o_ref[...] = (acc_ref[...] + b_ref[...]).astype(o_ref.dtype)


# ---------------------------------------------------------------------------
# Wrapper
# ---------------------------------------------------------------------------
def graph_convolution(x, adj, weight, bias=None, *,
                      compute_dtype=jnp.bfloat16,
                      tm=512, tk=2048, tn_cap=2048):
    """Pallas TPU forward of GraphConvolution.

    x      : (N, C_in)   node features
    adj    : (N, N)      (normalized) adjacency matrix
    weight : (C_in, C_out)
    bias   : optional, reshapeable to (1, C_out)
    returns: (N, C_out)  in x.dtype
    """
    n, c_in = x.shape
    c_out = weight.shape[1]
    assert weight.shape == (c_in, c_out)
    assert adj.shape == (n, n)
    out_dtype = x.dtype

    cd_bytes = jnp.dtype(compute_dtype).itemsize
    adj_bytes = jnp.dtype(adj.dtype).itemsize
    x_bytes = jnp.dtype(x.dtype).itemsize
    w_bytes = jnp.dtype(weight.dtype).itemsize
    out_bytes = jnp.dtype(out_dtype).itemsize

    # ---- static tile selection ---------------------------------------------
    tm_, n_p = _tile_and_pad(n, tm)
    tm_ = _split_rows_for_megacore(tm_, n_p)          # >=2 row tiles if possible
    tk_ = _largest_divisor_tile(n_p, tk)              # adj-column reduction tile

    c_out_p = _round_up(c_out, _LANE)
    if c_out_p <= tn_cap:
        tn_ = c_out_p              # single C_out tile -> adj streamed exactly once
    else:
        tn_, c_out_p = _tile_and_pad(c_out, 1024)

    tk1_, c_in_p = _tile_and_pad(c_in, 2048)          # C_in reduction tile

    # Phase-1 VMEM budget: shrink the C_in tile if needed.
    def p1_vmem(tk1):
        return (tm_ * tk1 * x_bytes * 2 + tk1 * tn_ * w_bytes * 2
                + tm_ * tn_ * cd_bytes * 2 + tm_ * tn_ * 4)
    while p1_vmem(tk1_) > _VMEM_BUDGET and tk1_ > _LANE:
        tk1_ = _largest_divisor_tile(c_in_p, tk1_ - _LANE)

    # Phase-2 VMEM budget: prefer a VMEM-resident support panel (read from HBM
    # once); otherwise stream it; then shrink tk_, then tm_.
    def p2_vmem(tm2, tk2, resident):
        s_rows = n_p if resident else tk2
        return (tm2 * tk2 * adj_bytes * 2 + s_rows * tn_ * cd_bytes * 2
                + tn_ * 4 * 2 + tm2 * tn_ * out_bytes * 2 + tm2 * tn_ * 4)

    resident = p2_vmem(tm_, tk_, True) <= _VMEM_BUDGET
    while p2_vmem(tm_, tk_, resident) > _VMEM_BUDGET:
        if tk_ > _LANE and tk_ >= tm_:
            tk_ = _largest_divisor_tile(n_p, tk_ - _LANE)
        elif tm_ > _LANE:
            tm_ = _largest_divisor_tile(n_p, tm_ - _LANE)
        else:
            break

    # ---- pad only if a dim is not already tile-aligned (no dtype cast) ------
    x_p = _pad2(x, n_p, c_in_p)
    w_p = _pad2(weight, c_in_p, c_out_p)
    adj_p = _pad2(adj, n_p, n_p)
    if bias is None:
        b_p = jnp.zeros((1, c_out_p), jnp.float32)
    else:
        b_p = _pad2(bias.reshape(1, -1).astype(jnp.float32), 1, c_out_p)

    # -------- Phase 1: support = x @ W  (computed exactly once) --------------
    g1 = (n_p // tm_, c_out_p // tn_, c_in_p // tk1_)
    support = pl.pallas_call(
        functools.partial(_support_kernel, compute_dtype=compute_dtype),
        out_shape=jax.ShapeDtypeStruct((n_p, c_out_p), compute_dtype),
        grid=g1,
        in_specs=[
            pl.BlockSpec((tm_, tk1_), lambda i, j, k: (i, k)),
            pl.BlockSpec((tk1_, tn_), lambda i, j, k: (k, j)),
        ],
        out_specs=pl.BlockSpec((tm_, tn_), lambda i, j, k: (i, j)),
        scratch_shapes=[pltpu.VMEM((tm_, tn_), jnp.float32)],
        compiler_params=pltpu.CompilerParams(
            dimension_semantics=("parallel", "parallel", "arbitrary"),
            vmem_limit_bytes=_VMEM_LIMIT),
        cost_estimate=pl.CostEstimate(
            flops=2 * n_p * c_in_p * c_out_p,
            bytes_accessed=(n_p * c_in_p * x_bytes
                            + c_in_p * c_out_p * w_bytes
                            + n_p * c_out_p * cd_bytes),
            transcendentals=0),
    )(x_p, w_p)

    # -------- Phase 2: out = adj @ support (+ bias) ---------------------------
    if resident:
        s_spec = pl.BlockSpec((n_p, tn_), lambda i, j, k: (0, j))
    else:
        s_spec = pl.BlockSpec((tk_, tn_), lambda i, j, k: (k, j))

    g2 = (n_p // tm_, c_out_p // tn_, n_p // tk_)
    j_tiles = c_out_p // tn_
    out_p = pl.pallas_call(
        functools.partial(_aggregate_kernel, compute_dtype=compute_dtype,
                          resident_support=resident, tk=tk_),
        out_shape=jax.ShapeDtypeStruct((n_p, c_out_p), out_dtype),
        grid=g2,
        in_specs=[
            pl.BlockSpec((tm_, tk_), lambda i, j, k: (i, k)),   # adj stream
            s_spec,                                             # support
            pl.BlockSpec((1, tn_), lambda i, j, k: (0, j)),     # bias (epilogue)
        ],
        out_specs=pl.BlockSpec((tm_, tn_), lambda i, j, k: (i, j)),
        scratch_shapes=[pltpu.VMEM((tm_, tn_), jnp.float32)],
        compiler_params=pltpu.CompilerParams(
            dimension_semantics=("parallel", "parallel", "arbitrary"),
            vmem_limit_bytes=_VMEM_LIMIT),
        cost_estimate=pl.CostEstimate(
            flops=2 * n_p * n_p * c_out_p,
            bytes_accessed=(n_p * n_p * adj_bytes * j_tiles
                            + n_p * c_out_p * cd_bytes
                              * (1 if resident else n_p // tm_)
                            + n_p * c_out_p * out_bytes),
            transcendentals=0),
    )(adj_p, support, b_p)

    if (n_p, c_out_p) != (n, c_out):
        out_p = out_p[:n, :c_out]
    return out_p


# Pure-JAX reference for correctness check.
def graph_convolution_ref(x, adj, weight, bias=None):
    support = x @ weight
    out = adj @ support
    if bias is not None:
        out = out + bias.reshape(1, -1)
    return out


# ---------------------------------------------------------------------------
# Deterministic parameter init (mirrors reset_parameters: U(-stdv, stdv),
# stdv = 1/sqrt(out_features)).
# ---------------------------------------------------------------------------
def init_params(key, in_features, out_features, use_bias=False):
    stdv = 1.0 / math.sqrt(out_features)
    kw, kb = jax.random.split(key)
    weight = jax.random.uniform(
        kw, (in_features, out_features), dtype=jnp.float32,
        minval=-stdv, maxval=stdv)
    bias = None
    if use_bias:
        bias = jax.random.uniform(
            kb, (1, 1, out_features), dtype=jnp.float32,
            minval=-stdv, maxval=stdv)
    return weight, bias


if __name__ == "__main__":
    key = jax.random.PRNGKey(0)
    k_x, k_adj, k_p, k_x2, k_adj2 = jax.random.split(key, 5)

    # ---- small, unaligned shapes (padded path) ------------------------------
    num_nodes, in_features, out_features = 16, 32, 64
    x = jax.random.normal(k_x, (num_nodes, in_features), dtype=jnp.float32)
    a_raw = jax.random.uniform(k_adj, (num_nodes, num_nodes), dtype=jnp.float32)
    a_sym = 0.5 * (a_raw + a_raw.T) + jnp.eye(num_nodes, dtype=jnp.float32)
    adj = a_sym / jnp.sum(a_sym, axis=-1, keepdims=True)
    weight, bias = init_params(k_p, in_features, out_features, use_bias=True)

    ref_nobias = graph_convolution_ref(x, adj, weight, None)
    ref_bias = graph_convolution_ref(x, adj, weight, bias)

    # f32 compute path (module default: bias=False) -- tight check.
    out_f32 = jax.block_until_ready(
        graph_convolution(x, adj, weight, None, compute_dtype=jnp.float32))
    assert out_f32.shape == (num_nodes, out_features)
    assert jnp.allclose(out_f32, ref_nobias, atol=2e-3, rtol=2e-3), \
        "f32 path mismatch vs reference"

    # bf16 MXU path (default) with bias -- loose check (bf16 operand rounding).
    out_bf16 = jax.block_until_ready(graph_convolution(x, adj, weight, bias))
    assert out_bf16.shape == (num_nodes, out_features)
    assert jnp.allclose(out_bf16, ref_bias, atol=5e-2, rtol=5e-2), \
        "bf16 path mismatch vs reference"

    # ---- 128-aligned shapes (zero-copy path, resident support, 2 row tiles) -
    n2, ci2, co2 = 256, 128, 128
    x2 = jax.random.normal(k_x2, (n2, ci2), dtype=jnp.float32)
    a2 = jax.random.uniform(k_adj2, (n2, n2), dtype=jnp.float32)
    a2 = 0.5 * (a2 + a2.T) + jnp.eye(n2, dtype=jnp.float32)
    adj2 = a2 / jnp.sum(a2, axis=-1, keepdims=True)
    w2, b2 = init_params(jax.random.PRNGKey(1), ci2, co2, use_bias=True)

    ref2 = graph_convolution_ref(x2, adj2, w2, b2)
    out2 = jax.block_until_ready(
        graph_convolution(x2, adj2, w2, b2, compute_dtype=jnp.float32))
    assert out2.shape == (n2, co2)
    assert jnp.allclose(out2, ref2, atol=1e-2, rtol=1e-2), \
        "aligned-path mismatch vs reference"

    print("KERNEL_OK")
</pallas_src>

<mosaic_0001>
module attributes {stable_mosaic.version = 11 : i64} {
  func.func @_support_kernel(%arg0: i32, %arg1: i32, %arg2: i32, %arg3: memref<128x128xf32, #tpu.memory_space<vmem>>, %arg4: memref<128x128xf32, #tpu.memory_space<vmem>>, %arg5: memref<128x128xf32, #tpu.memory_space<vmem>>, %arg6: memref<128x128xf32, #tpu.memory_space<vmem>>) attributes {dimension_semantics = [#tpu.dimension_semantics<parallel>, #tpu.dimension_semantics<parallel>, #tpu.dimension_semantics<arbitrary>], iteration_bounds = array<i64: 1, 1, 1>, scalar_prefetch = 0 : i64, scratch_operands = 1 : i64, tpu.core_type = #tpu.core_type<tc>, window_params = [{transform_indices = @transform_0, window_bounds = array<i64: 128, 128>}, {transform_indices = @transform_1, window_bounds = array<i64: 128, 128>}, {transform_indices = @transform_2, window_bounds = array<i64: 128, 128>}]} {
    %c0_i32 = arith.constant 0 : i32
    %0 = arith.cmpi eq, %arg2, %c0_i32 : i32
    %1 = arith.extui %0 : i1 to i32
    %c0_i32_0 = arith.constant 0 : i32
    %2 = arith.cmpi ne, %1, %c0_i32_0 : i32
    scf.if %2 {
      %cst_10 = arith.constant 0.000000e+00 : f32
      %12 = vector.broadcast %cst_10 : f32 to vector<128x128xf32>
      %c0_11 = arith.constant 0 : index
      %c0_12 = arith.constant 0 : index
      %13 = vector.load %arg6[%c0_11, %c0_12] : memref<128x128xf32, #tpu.memory_space<vmem>>, vector<128x128xf32>
      tpu.vector_store %arg6[%c0_11, %c0_12], %12 {strides = array<i32>} : memref<128x128xf32, #tpu.memory_space<vmem>>, vector<128x128xf32>,
    } else {
    }
    %c0 = arith.constant 0 : index
    %c0_1 = arith.constant 0 : index
    %3 = vector.load %arg6[%c0, %c0_1] : memref<128x128xf32, #tpu.memory_space<vmem>>, vector<128x128xf32>
    %c0_2 = arith.constant 0 : index
    %c0_3 = arith.constant 0 : index
    %4 = vector.load %arg3[%c0_2, %c0_3] : memref<128x128xf32, #tpu.memory_space<vmem>>, vector<128x128xf32>
    %c0_4 = arith.constant 0 : index
    %c0_5 = arith.constant 0 : index
    %5 = vector.load %arg4[%c0_4, %c0_5] : memref<128x128xf32, #tpu.memory_space<vmem>>, vector<128x128xf32>
    %cst = arith.constant dense<0.000000e+00> : vector<128x128xf32>
    %6 = tpu.matmul %4, %5, %cst {dimension_numbers = #tpu.dot_dimension_numbers<[1], [0], [0], [1], [0, 0, 1, 1], [], []>} : vector<128x128xf32>, vector<128x128xf32>, vector<128x128xf32> -> vector<128x128xf32>
    %7 = arith.addf %3, %6 : vector<128x128xf32>
    %c0_6 = arith.constant 0 : index
    %c0_7 = arith.constant 0 : index
    %8 = vector.load %arg6[%c0_6, %c0_7] : memref<128x128xf32, #tpu.memory_space<vmem>>, vector<128x128xf32>
    tpu.vector_store %arg6[%c0_6, %c0_7], %7 {strides = array<i32>} : memref<128x128xf32, #tpu.memory_space<vmem>>, vector<128x128xf32>,
    %c0_i32_8 = arith.constant 0 : i32
    %9 = arith.cmpi eq, %arg2, %c0_i32_8 : i32
    %10 = arith.extui %9 : i1 to i32
    %c0_i32_9 = arith.constant 0 : i32
    %11 = arith.cmpi ne, %10, %c0_i32_9 : i32
    scf.if %11 {
      %c0_10 = arith.constant 0 : index
      %c0_11 = arith.constant 0 : index
      %12 = vector.load %arg6[%c0_10, %c0_11] : memref<128x128xf32, #tpu.memory_space<vmem>>, vector<128x128xf32>
      %c0_12 = arith.constant 0 : index
      %c0_13 = arith.constant 0 : index
      %13 = vector.load %arg5[%c0_12, %c0_13] : memref<128x128xf32, #tpu.memory_space<vmem>>, vector<128x128xf32>
      tpu.vector_store %arg5[%c0_12, %c0_13], %12 {strides = array<i32>} : memref<128x128xf32, #tpu.memory_space<vmem>>, vector<128x128xf32>,
    } else {
    }
    return
  }
  func.func @transform_0(%arg0: i32, %arg1: i32, %arg2: i32) -> (i32, i32) {
    %c0_i32 = arith.constant 0 : i32
    return %arg0, %arg2 : i32, i32
  }
  func.func @transform_1(%arg0: i32, %arg1: i32, %arg2: i32) -> (i32, i32) {
    %c0_i32 = arith.constant 0 : i32
    return %arg2, %arg1 : i32, i32
  }
  func.func @transform_2(%arg0: i32, %arg1: i32, %arg2: i32) -> (i32, i32) {
    %c0_i32 = arith.constant 0 : i32
    return %arg0, %arg1 : i32, i32
  }
}

</mosaic_0001>

<bundles_post_ra>
// kernel: tpu_custom_call.1
= control target key start
LH: loop header
LB: loop body
LE: loop exit
PB: predicated region body
PF: predicated region fallthrough
CT: control target
= control target key end

     0   :  { %7 = vsyncpa [#allocation4], 0  ;;  %s616_s0 = inlined_call_operand.hbm [shape: f32[128,128], index: 0, kind: input, shape index: {}]   ;;  %s617_s1 = inlined_call_operand.hbm [shape: f32[128,128], index: 1, kind: input, shape index: {}]   ;;  %s618_s2 = inlined_call_operand.hbm [shape: f32[128,128], index: 2, kind: output, shape index: {}]  }
   0x1   :  { %8 = vsyncpa [#allocation7], 0 }
   0x2   :  { %9 = vsyncpa [#allocation5], 0  ;;  %s551_s9 = smov [#allocation3]   ;;  %s479_s13 = scalar_lea.hbm %s616_s0, 2048 }
   0x3   :  { %s15_s10 = sshll.u32 %s551_s9, 4  ;;  %p480_p0 = scmp.ne.s32.totalorder %s616_s0, %s479_s13  ;;  %s16_s10 = int_to_ptr.vmem [resolvable:$true] %s15_s10 }
   0x4   :  { %p483_p1 = scmp.lt.u32.totalorder %s479_s13, %s616_s0 }
   0x6   :  { %p485_p2 = pnand %p483_p1, %p480_p0 }
   0x8   :  { %488 = shalt.err (!%p485_p2)
}
   0x9   :  { %s489_s18 = scalar_lea.vmem %s16_s10, 2048  ;;  %p494_p4 = scmp.lt.s32.totalorder %s16_s10, %s16_s10 }
   0xa   :  { %p490_p3 = scmp.ne.s32.totalorder %s16_s10, %s489_s18  ;;  %p495_p5 = scmp.lt.s32.totalorder %s489_s18, %s489_s18 }
   0xc   :  { %p496_p6 = por %p495_p5, %p494_p4 }
   0xe   :  { %p497_p7 = pnand %p496_p6, %p490_p3 }
  0x10   :  { %500 = shalt.err (!%p497_p7)
}
  0x11   :  { %s552_s19 = smov 128   ;;  %s553_s20 = smov 8  }
  0x12   :  { %21 = dma.hbm_to_vmem [thread:$0]  %s616_s0, 2048, %s16_s10, [#allocation4], %s552_s19, %s552_s19, %s553_s20  }
  0x13   :  { %s554_s23 = smov [#allocation6]   ;;  %s501_s27 = scalar_lea.hbm %s617_s1, 2048 }
  0x14   :  { %s27_s24 = sshll.u32 %s554_s23, 4  ;;  %p502_p8 = scmp.ne.s32.totalorder %s617_s1, %s501_s27  ;;  %s28_s24 = int_to_ptr.vmem [resolvable:$true] %s27_s24 }
  0x15   :  { %p505_p9 = scmp.lt.u32.totalorder %s501_s27, %s617_s1 }
  0x17   :  { %p507_p10 = pnand %p505_p9, %p502_p8 }
  0x19   :  { %510 = shalt.err (!%p507_p10)
}
  0x1a   :  { %s511_s4 = scalar_lea.vmem %s28_s24, 2048  ;;  %p516_p12 = scmp.lt.s32.totalorder %s28_s24, %s28_s24 }
  0x1b   :  { %p512_p11 = scmp.ne.s32.totalorder %s28_s24, %s511_s4  ;;  %p517_p13 = scmp.lt.s32.totalorder %s511_s4, %s511_s4 }
  0x1d   :  { %p518_p0 = por %p517_p13, %p516_p12 }
  0x1f   :  { %p519_p1 = pnand %p518_p0, %p512_p11 }
  0x21   :  { %522 = shalt.err (!%p519_p1)
}
  0x22   :  { %33 = dma.hbm_to_vmem [thread:$0]  %s617_s1, 2048, %s28_s24, [#allocation7], %s552_s19, %s552_s19, %s553_s20  }
  0x23   :  { %545 = dma.done.wait [#allocation4], 2048  }
  0x24   :  { %546 = vsyncadd [#allocation4], 4294965248 }
  0x25   :  { %547 = dma.done.wait [#allocation7], 2048  }
  0x26   :  { %548 = vsyncadd [#allocation7], 4294965248  ;;  %v92_v0 = vld [vmem:[#allocation6] sm:$0xff]  ;;  %v93_v1 = vld [vmem:[#allocation6 + $0x8] sm:$0xff]  ;;  %s555_s1 = smov [#allocation8]  }
  0x27   :  { %v94_v2 = vld [vmem:[#allocation6 + $0x10] sm:$0xff]  ;;  %v426_v3 = vpack.c.bf16 %v93_v1, %v92_v0  ;;  %v95_v4 = vld [vmem:[#allocation6 + $0x18] sm:$0xff]  ;;  %v96_v6 = vld [vmem:[#allocation6 + $0x20] sm:$0xff]  ;;  %s325_s6 = sshll.u32 %s555_s1, 4  ;;  %s326_s6 = int_to_ptr.vmem [resolvable:$true] %s325_s6 }
  0x28   :  { %v430_v5 = vpack.c.bf16 %v95_v4, %v94_v2  ;;  %v97_v7 = vld [vmem:[#allocation6 + $0x28] sm:$0xff]  ;;  %v76_v9 = vld [vmem:[#allocation3] sm:$0xff]  ;;  %v98_v11 = vld [vmem:[#allocation6 + $0x30] sm:$0xff]  ;;  %s523_s7 = scalar_lea.vmem %s326_s6, 2048  ;;  %p528_p3 = scmp.lt.s32.totalorder %s326_s6, %s326_s6 }
  0x29   :  { %427 = vmatprep.subr.bf16.mxu0 %v426_v3  ;;  %458 = vmatprep.subr.bf16.mxu1 %v426_v3  ;;  %v434_v8 = vpack.c.bf16 %v97_v7, %v96_v6  ;;  %v84_v10 = vld [vmem:[#allocation3 + $0x40] sm:$0xff]  ;;  %v99_v12 = vld [vmem:[#allocation6 + $0x38] sm:$0xff]  ;;  %v101_v15 = vld [vmem:[#allocation6 + $0x48] sm:$0xff]  ;;  %p524_p2 = scmp.ne.s32.totalorder %s326_s6, %s523_s7  ;;  %p529_p4 = scmp.lt.s32.totalorder %s523_s7, %s523_s7 }
  0x2a   :  { %429 = vmatpush3.bf16.msra.mxu0 %v426_v3  ;;  %466 = vmatpush3.bf16.msra.mxu1 %v426_v3  ;;  %v438_v13 = vpack.c.bf16 %v99_v12, %v98_v11  ;;  %v100_v14 = vld [vmem:[#allocation6 + $0x40] sm:$0xff]  ;;  %v102_v17 = vld [vmem:[#allocation6 + $0x50] sm:$0xff]  ;;  %v103_v18 = vld [vmem:[#allocation6 + $0x58] sm:$0xff] }
  0x2b   :  { %431 = vmatprep.subr.bf16.mxu0 %v430_v5  ;;  %459 = vmatprep.subr.bf16.mxu1 %v430_v5  ;;  %v442_v16 = vpack.c.bf16 %v101_v15, %v100_v14  ;;  %v446_v19 = vpack.c.bf16 %v103_v18, %v102_v17  ;;  %v104_v20 = vld [vmem:[#allocation6 + $0x60] sm:$0xff]  ;;  %v105_v21 = vld [vmem:[#allocation6 + $0x68] sm:$0xff]  ;;  %v106_v23 = vld [vmem:[#allocation6 + $0x70] sm:$0xff]  ;;  %p530_p5 = por %p529_p4, %p528_p3 }
  0x2c   :  { %402 = vmatprep.mubr.f32.mxu0 %v76_v9  ;;  %414 = vmatprep.mubr.f32.mxu1 %v84_v10  ;;  %v450_v22 = vpack.c.bf16 %v105_v21, %v104_v20  ;;  %v107_v24 = vld [vmem:[#allocation6 + $0x78] sm:$0xff]  ;;  %v77_v26 = vld [vmem:[#allocation3 + $0x8] sm:$0xff]  ;;  %v78_v28 = vld [vmem:[#allocation3 + $0x10] sm:$0xff] }
  0x2d   :  { %v454_v25 = vpack.c.bf16 %v107_v24, %v106_v23  ;;  %v85_v27 = vld [vmem:[#allocation3 + $0x48] sm:$0xff]  ;;  %v86_v29 = vld [vmem:[#allocation3 + $0x50] sm:$0xff]  ;;  %v79_v30 = vld [vmem:[#allocation3 + $0x18] sm:$0xff]  ;;  %p531_p6 = pnand %p530_p5, %p524_p2 }
  0x2e   :  { %433 = vmatpush3.bf16.msra.mxu0 %v430_v5  ;;  %467 = vmatpush3.bf16.msra.mxu1 %v430_v5  ;;  %v87_v31 = vld [vmem:[#allocation3 + $0x58] sm:$0xff]  ;;  %v80_v32 = vld [vmem:[#allocation3 + $0x20] sm:$0xff]  ;;  %v81_v34 = vld [vmem:[#allocation3 + $0x28] sm:$0xff] }
  0x2f   :  { %435 = vmatprep.subr.bf16.mxu0 %v434_v8  ;;  %460 = vmatprep.subr.bf16.mxu1 %v434_v8  ;;  %v88_v33 = vld [vmem:[#allocation3 + $0x60] sm:$0xff]  ;;  %v89_v35 = vld [vmem:[#allocation3 + $0x68] sm:$0xff]  ;;  %v82_v36 = vld [vmem:[#allocation3 + $0x30] sm:$0xff] }
  0x30   :  { %v90_v37 = vld [vmem:[#allocation3 + $0x70] sm:$0xff]  ;;  %v83_v38 = vld [vmem:[#allocation3 + $0x38] sm:$0xff] }
  0x31   :  { %v91_v39 = vld [vmem:[#allocation3 + $0x78] sm:$0xff] }
  0x32   :  { %437 = vmatpush3.bf16.msra.mxu0 %v434_v8  ;;  %468 = vmatpush3.bf16.msra.mxu1 %v434_v8 }
  0x33   :  { %439 = vmatprep.subr.bf16.mxu0 %v438_v13  ;;  %461 = vmatprep.subr.bf16.mxu1 %v438_v13 }
  0x36   :  { %441 = vmatpush3.bf16.msra.mxu0 %v438_v13  ;;  %469 = vmatpush3.bf16.msra.mxu1 %v438_v13 }
  0x37   :  { %443 = vmatprep.subr.bf16.mxu0 %v442_v16  ;;  %462 = vmatprep.subr.bf16.mxu1 %v442_v16 }
  0x3a   :  { %445 = vmatpush3.bf16.msra.mxu0 %v442_v16  ;;  %470 = vmatpush3.bf16.msra.mxu1 %v442_v16 }
  0x3b   :  { %447 = vmatprep.subr.bf16.mxu0 %v446_v19  ;;  %463 = vmatprep.subr.bf16.mxu1 %v446_v19 }
  0x3e   :  { %449 = vmatpush3.bf16.msra.mxu0 %v446_v19  ;;  %471 = vmatpush3.bf16.msra.mxu1 %v446_v19 }
  0x3f   :  { %451 = vmatprep.subr.bf16.mxu0 %v450_v22  ;;  %464 = vmatprep.subr.bf16.mxu1 %v450_v22 }
  0x42   :  { %453 = vmatpush3.bf16.msra.mxu0 %v450_v22  ;;  %472 = vmatpush3.bf16.msra.mxu1 %v450_v22 }
  0x43   :  { %455 = vmatprep.subr.bf16.mxu0 %v454_v25  ;;  %465 = vmatprep.subr.bf16.mxu1 %v454_v25 }
  0x46   :  { %457 = vmatpush3.bf16.msra.mxu0 %v454_v25  ;;  %473 = vmatpush3.bf16.msra.mxu1 %v454_v25 }
  0x49   :  { %403 = vmatmul.mubr.f32.vlgmr.msra.gmra.mrb[0].mxu0 %v77_v26  ;;  %415 = vmatmul.mubr.f32.vlgmr.msra.gmra.mrb[0].mxu1 %v85_v27 }
  0x4a   :  { %405 = vmatprep.mubr.f32.mxu0 %v78_v28  ;;  %417 = vmatprep.mubr.f32.mxu1 %v86_v29 }
  0x4d   :  { %406 = vmatmul.mubr.f32.gmra.mrb[2].mxu0 %v79_v30  ;;  %418 = vmatmul.mubr.f32.gmra.mrb[2].mxu1 %v87_v31 }
  0x4e   :  { %408 = vmatprep.mubr.f32.mxu0 %v80_v32  ;;  %420 = vmatprep.mubr.f32.mxu1 %v88_v33 }
  0x51   :  { %409 = vmatmul.mubr.f32.gmra.mrb[4].mxu0 %v81_v34  ;;  %421 = vmatmul.mubr.f32.gmra.mrb[4].mxu1 %v89_v35 }
  0x52   :  { %411 = vmatprep.mubr.f32.mxu0 %v82_v36  ;;  %423 = vmatprep.mubr.f32.mxu1 %v90_v37 }
  0x55   :  { %412 = vmatmul.mubr.f32.gmra.mrb[6].mxu0 %v83_v38  ;;  %424 = vmatmul.mubr.f32.gmra.mrb[6].mxu1 %v91_v39 }
 0x11c   :  { %v404_v40 = vpop.f32.mrb[0].mxu0  ;;  %v416_v41 = vpop.f32.mrb[0].mxu1 }
 0x11d   :  { %305 = vst [vmem:[#allocation8 + $0x8] sm:$0xff] %v404_v40  ;;  %313 = vst [vmem:[#allocation8 + $0x48] sm:$0xff] %v416_v41  ;;  %v174_v42 = vpop.f32.mrb[1].mxu0  ;;  %v214_v43 = vpop.f32.mrb[1].mxu1 }
 0x11e   :  { %304 = vst [vmem:[#allocation8] sm:$0xff] %v174_v42  ;;  %312 = vst [vmem:[#allocation8 + $0x40] sm:$0xff] %v214_v43 }
 0x120   :  { %v407_v44 = vpop.f32.mrb[2].mxu0  ;;  %v419_v45 = vpop.f32.mrb[2].mxu1 }
 0x121   :  { %307 = vst [vmem:[#allocation8 + $0x18] sm:$0xff] %v407_v44  ;;  %315 = vst [vmem:[#allocation8 + $0x58] sm:$0xff] %v419_v45  ;;  %v184_v46 = vpop.f32.mrb[3].mxu0  ;;  %v224_v47 = vpop.f32.mrb[3].mxu1 }
 0x122   :  { %306 = vst [vmem:[#allocation8 + $0x10] sm:$0xff] %v184_v46  ;;  %314 = vst [vmem:[#allocation8 + $0x50] sm:$0xff] %v224_v47 }
 0x124   :  { %v410_v48 = vpop.f32.mrb[4].mxu0  ;;  %v422_v49 = vpop.f32.mrb[4].mxu1 }
 0x125   :  { %309 = vst [vmem:[#allocation8 + $0x28] sm:$0xff] %v410_v48  ;;  %317 = vst [vmem:[#allocation8 + $0x68] sm:$0xff] %v422_v49  ;;  %v194_v50 = vpop.f32.mrb[5].mxu0  ;;  %v234_v51 = vpop.f32.mrb[5].mxu1 }
 0x126   :  { %308 = vst [vmem:[#allocation8 + $0x20] sm:$0xff] %v194_v50  ;;  %316 = vst [vmem:[#allocation8 + $0x60] sm:$0xff] %v234_v51 }
 0x128   :  { %v413_v52 = vpop.f32.mrb[6].mxu0  ;;  %v425_v53 = vpop.f32.mrb[6].mxu1 }
 0x129   :  { %311 = vst [vmem:[#allocation8 + $0x38] sm:$0xff] %v413_v52  ;;  %319 = vst [vmem:[#allocation8 + $0x78] sm:$0xff] %v425_v53  ;;  %v204_v54 = vpop.f32.mrb[7].mxu0  ;;  %v244_v55 = vpop.f32.mrb[7].mxu1 }
 0x12a   :  { %310 = vst [vmem:[#allocation8 + $0x30] sm:$0xff] %v204_v54  ;;  %318 = vst [vmem:[#allocation8 + $0x70] sm:$0xff] %v244_v55 }
 0x12b   :  { %534 = shalt.err (!%p531_p6)
}
 0x12c   :  { %s535_s10 = scalar_lea.hbm %s618_s2, 2048 }
 0x12d   :  { %p536_p7 = scmp.ne.s32.totalorder %s618_s2, %s535_s10  ;;  %p539_p8 = scmp.lt.u32.totalorder %s535_s10, %s618_s2 }
 0x12f   :  { %p541_p9 = pnand %p539_p8, %p536_p7 }
 0x131   :  { %544 = shalt.err (!%p541_p9)
}
 0x132   :  { %331 = dma.vmem_to_hbm [thread:$0]  %s326_s6, 2048, %s618_s2, [#allocation5], %s552_s19, %s552_s19, %s553_s20  }
 0x133   :  { %549 = dma.done.wait [#allocation5], 2048  }
 0x134   :  { %550 = vsyncadd [#allocation5], 4294965248 }
 0x135   :  { %335 = vsyncpa [#allocation4], 1 }
 0x136   :  { %336 = vsyncpa [#allocation7], 1 }
 0x137   :  { %337 = vsyncpa [#allocation5], 1 }

</bundles_post_ra>
